<compile_context>
chip_gen: v5e
topology: v5e:2x2
jax: 0.10.0
libtpu: 0.0.40
codegen_flags: <defaults>
</compile_context>

<pallas_src>
import jax
import jax.numpy as jnp
from jax.experimental import pallas as pl
from jax.experimental.pallas import tpu as pltpu


def _round_up(x: int, m: int) -> int:
    return ((x + m - 1) // m) * m


def _linear_kernel_acc(x_ref, wt_ref, b_ref, o_ref, acc_ref):
    """y = x @ W^T + b with a K-reduction grid axis and an f32 accumulator."""
    k = pl.program_id(2)

    @pl.when(k == 0)
    def _init():
        acc_ref[...] = jnp.zeros_like(acc_ref)

    acc_ref[...] += jnp.dot(
        x_ref[...], wt_ref[...], preferred_element_type=jnp.float32
    )

    @pl.when(k == pl.num_programs(2) - 1)
    def _finalize():
        # Bias add once, in the epilogue, on the f32 accumulator.
        o_ref[...] = (acc_ref[...] + b_ref[...]).astype(o_ref.dtype)


def _linear_kernel_single_k(x_ref, wt_ref, b_ref, o_ref):
    """Fast path: whole K in one tile -> no accumulator scratch, no pl.when."""
    acc = jnp.dot(x_ref[...], wt_ref[...], preferred_element_type=jnp.float32)
    o_ref[...] = (acc + b_ref[...]).astype(o_ref.dtype)


class PallasLinear:
    """Pallas TPU implementation of nn.Linear: y = x @ W^T + b.

    Weight transpose / padding is done once here (parameter-load time), not on
    every forward call.
    """

    def __init__(self, weight, bias, *, compute_dtype=jnp.float32,
                 tm=512, tn=512, tk=512, batch_hint=None):
        C, D = weight.shape
        self.D, self.C = D, C
        self.compute_dtype = compute_dtype
        # Sublane alignment for the second-minor dim: 8 for f32, 16 for bf16.
        self.sub_align = 16 if compute_dtype == jnp.bfloat16 else 8
        self.tm_cap = tm

        lane = 128
        tn = min(tn, _round_up(C, lane))
        tk = min(tk, _round_up(D, lane))

        # Small-batch hint (inference): M will be a single block, so grow K to
        # amortize per-step overhead and split N into >= 2 blocks (when C
        # allows) so both v7x TensorCores get work.
        if batch_hint is not None and _round_up(batch_hint, self.sub_align) <= tm:
            tk = min(1024, _round_up(D, lane))
            if _round_up(C, lane) >= 2 * lane:
                while tn > lane and _round_up(C, tn) // tn < 2:
                    tn = _round_up(max(tn // 2, lane), lane)

        self.tn, self.tk = tn, tk
        Kp = _round_up(D, tk)
        Np = _round_up(C, tn)
        self.Kp, self.Np = Kp, Np

        # Hoisted: one-time transpose to (D, C) + zero-pad to tile multiples.
        self.wt = (
            jnp.zeros((Kp, Np), compute_dtype)
            .at[:D, :C]
            .set(weight.T.astype(compute_dtype))
        )
        # Bias stays f32: it is added on the f32 accumulator in the epilogue.
        self.b = jnp.zeros((1, Np), jnp.float32).at[0, :C].set(
            bias.astype(jnp.float32)
        )

    def __call__(self, x):
        B, D = x.shape
        assert D == self.D, f"expected input dim {self.D}, got {D}"
        tn, tk, Kp, Np = self.tn, self.tk, self.Kp, self.Np

        tm = min(self.tm_cap, _round_up(B, self.sub_align))
        Mp = _round_up(B, tm)

        xc = x.astype(self.compute_dtype)
        if (Mp, Kp) != (B, D):
            xp = jnp.zeros((Mp, Kp), self.compute_dtype).at[:B, :D].set(xc)
        else:
            xp = xc  # already tile-aligned: no padding copy

        out_dtype = x.dtype
        in_sz = jnp.dtype(self.compute_dtype).itemsize
        out_sz = jnp.dtype(out_dtype).itemsize
        # Double-buffered x / W^T / bias / out tiles + f32 accumulator.
        footprint = (
            2 * (tm * tk + tk * tn + tn) * in_sz
            + 2 * tm * tn * out_sz
            + tm * tn * 4
        )
        # Explicit VMEM budget: +50% headroom, capped well under v7x's 64 MiB.
        vmem_limit = int(min(max(int(1.5 * footprint), 16 << 20), 48 << 20))

        nk = Kp // tk
        grid_mn = (Mp // tm, Np // tn)

        if nk == 1:
            out_padded = pl.pallas_call(
                _linear_kernel_single_k,
                out_shape=jax.ShapeDtypeStruct((Mp, Np), out_dtype),
                grid_spec=pltpu.PrefetchScalarGridSpec(
                    num_scalar_prefetch=0,
                    grid=grid_mn,
                    in_specs=[
                        pl.BlockSpec((tm, tk), lambda i, j: (i, 0)),  # x
                        pl.BlockSpec((tk, tn), lambda i, j: (0, j)),  # W^T
                        pl.BlockSpec((1, tn), lambda i, j: (0, j)),   # bias
                    ],
                    out_specs=pl.BlockSpec((tm, tn), lambda i, j: (i, j)),
                ),
                compiler_params=pltpu.CompilerParams(
                    dimension_semantics=("parallel", "parallel"),
                    vmem_limit_bytes=vmem_limit,
                ),
            )(xp, self.wt, self.b)
        else:
            out_padded = pl.pallas_call(
                _linear_kernel_acc,
                out_shape=jax.ShapeDtypeStruct((Mp, Np), out_dtype),
                grid_spec=pltpu.PrefetchScalarGridSpec(
                    num_scalar_prefetch=0,
                    grid=grid_mn + (nk,),
                    in_specs=[
                        pl.BlockSpec((tm, tk), lambda i, j, k: (i, k)),  # x
                        pl.BlockSpec((tk, tn), lambda i, j, k: (k, j)),  # W^T
                        pl.BlockSpec((1, tn), lambda i, j, k: (0, j)),   # bias
                    ],
                    out_specs=pl.BlockSpec((tm, tn), lambda i, j, k: (i, j)),
                    scratch_shapes=[pltpu.VMEM((tm, tn), jnp.float32)],
                ),
                compiler_params=pltpu.CompilerParams(
                    dimension_semantics=("parallel", "parallel", "arbitrary"),
                    vmem_limit_bytes=vmem_limit,
                ),
            )(xp, self.wt, self.b)

        if (Mp, Np) != (B, self.C):
            return out_padded[:B, : self.C]
        return out_padded


if __name__ == "__main__":
    # Small shapes consistent with the module: batch=2, input_dim=32, classes=8.
    batch_size = 2
    input_dimension = 32
    num_classes = 8

    key = jax.random.PRNGKey(0)
    kx, kw, kb = jax.random.split(key, 3)

    x = jax.random.normal(kx, (batch_size, input_dimension), dtype=jnp.float32)
    # Deterministic init mimicking nn.Linear's uniform(-1/sqrt(D), 1/sqrt(D)).
    bound = 1.0 / (input_dimension ** 0.5)
    weight = jax.random.uniform(
        kw, (num_classes, input_dimension), minval=-bound, maxval=bound,
        dtype=jnp.float32)
    bias = jax.random.uniform(
        kb, (num_classes,), minval=-bound, maxval=bound, dtype=jnp.float32)

    ref = x @ weight.T + bias

    # f32 path (matches nn.Linear): params prepared once, reused per call.
    model_f32 = PallasLinear(weight, bias, compute_dtype=jnp.float32,
                             batch_hint=batch_size)
    out = jax.block_until_ready(model_f32(x))
    assert out.shape == (batch_size, num_classes)
    assert jnp.allclose(out, ref, atol=1e-5, rtol=1e-5)

    # Optional bf16 feed with f32 accumulation (halves weight-stream bytes,
    # doubles MXU rate on v6e/v7x); loose tolerance for the reduced precision.
    model_bf16 = PallasLinear(weight, bias, compute_dtype=jnp.bfloat16,
                              batch_hint=batch_size)
    out_bf16 = jax.block_until_ready(model_bf16(x))
    assert out_bf16.shape == (batch_size, num_classes)
    assert jnp.allclose(out_bf16, ref, atol=1e-1, rtol=1e-1)

    print("KERNEL_OK")
</pallas_src>

<mosaic_0001>
module attributes {stable_mosaic.version = 11 : i64} {
  func.func @_linear_kernel_single_k(%arg0: i32, %arg1: i32, %arg2: memref<8x128xf32, #tpu.memory_space<vmem>>, %arg3: memref<128x128xf32, #tpu.memory_space<vmem>>, %arg4: memref<1x128xf32, #tpu.memory_space<vmem>>, %arg5: memref<8x128xf32, #tpu.memory_space<vmem>>) attributes {dimension_semantics = [#tpu.dimension_semantics<parallel>, #tpu.dimension_semantics<parallel>], iteration_bounds = array<i64: 1, 1>, scalar_prefetch = 0 : i64, scratch_operands = 0 : i64, tpu.core_type = #tpu.core_type<tc>, window_params = [{transform_indices = @transform_0, window_bounds = array<i64: 8, 128>}, {transform_indices = @transform_1, window_bounds = array<i64: 128, 128>}, {transform_indices = @transform_2, window_bounds = array<i64: 1, 128>}, {transform_indices = @transform_3, window_bounds = array<i64: 8, 128>}]} {
    %c0 = arith.constant 0 : index
    %c0_0 = arith.constant 0 : index
    %0 = vector.load %arg2[%c0, %c0_0] : memref<8x128xf32, #tpu.memory_space<vmem>>, vector<8x128xf32>
    %c0_1 = arith.constant 0 : index
    %c0_2 = arith.constant 0 : index
    %1 = vector.load %arg3[%c0_1, %c0_2] : memref<128x128xf32, #tpu.memory_space<vmem>>, vector<128x128xf32>
    %cst = arith.constant dense<0.000000e+00> : vector<8x128xf32>
    %2 = tpu.matmul %0, %1, %cst {dimension_numbers = #tpu.dot_dimension_numbers<[1], [0], [0], [1], [0, 0, 1, 1], [], []>} : vector<8x128xf32>, vector<128x128xf32>, vector<8x128xf32> -> vector<8x128xf32>
    %c0_3 = arith.constant 0 : index
    %c0_4 = arith.constant 0 : index
    %3 = vector.load %arg4[%c0_3, %c0_4] : memref<1x128xf32, #tpu.memory_space<vmem>>, vector<1x128xf32>
    %4 = vector.broadcast %3 : vector<1x128xf32> to vector<8x128xf32>
    %5 = arith.addf %2, %4 : vector<8x128xf32>
    %c0_5 = arith.constant 0 : index
    %c0_6 = arith.constant 0 : index
    %6 = vector.load %arg5[%c0_5, %c0_6] : memref<8x128xf32, #tpu.memory_space<vmem>>, vector<8x128xf32>
    tpu.vector_store %arg5[%c0_5, %c0_6], %5 {strides = array<i32>} : memref<8x128xf32, #tpu.memory_space<vmem>>, vector<8x128xf32>,
    return
  }
  func.func @transform_0(%arg0: i32, %arg1: i32) -> (i32, i32) {
    %c0_i32 = arith.constant 0 : i32
    %c0_i32_0 = arith.constant 0 : i32
    return %arg0, %c0_i32 : i32, i32
  }
  func.func @transform_1(%arg0: i32, %arg1: i32) -> (i32, i32) {
    %c0_i32 = arith.constant 0 : i32
    %c0_i32_0 = arith.constant 0 : i32
    return %c0_i32, %arg1 : i32, i32
  }
  func.func @transform_2(%arg0: i32, %arg1: i32) -> (i32, i32) {
    %c0_i32 = arith.constant 0 : i32
    %c0_i32_0 = arith.constant 0 : i32
    return %c0_i32, %arg1 : i32, i32
  }
  func.func @transform_3(%arg0: i32, %arg1: i32) -> (i32, i32) {
    %c0_i32 = arith.constant 0 : i32
    return %arg0, %arg1 : i32, i32
  }
}

</mosaic_0001>

<bundles_post_ra>
// kernel: tpu_custom_call.1
= control target key start
LH: loop header
LB: loop body
LE: loop exit
PB: predicated region body
PF: predicated region fallthrough
CT: control target
= control target key end

     0   :  { %8 = vsyncpa [#allocation3], 0  ;;  %s226_s0 = inlined_call_operand.hbm [shape: f32[8,128], index: 0, kind: input, shape index: {}]   ;;  %s227_s1 = inlined_call_operand.hbm [shape: f32[128,128], index: 1, kind: input, shape index: {}]   ;;  %s228_s2 = inlined_call_operand.vmem [shape: f32[1,128], index: 2, kind: input, shape index: {}]   ;;  %s229_s3 = inlined_call_operand.hbm [shape: f32[8,128], index: 3, kind: output, shape index: {}]  }
   0x1   :  { %9 = vsyncpa [#allocation6], 0 }
   0x2   :  { %10 = vsyncpa [#allocation4], 0  ;;  %s16_s14 = sshll.u32 %s226_s0, 4  ;;  %s189_s15 = smov [#allocation2]   ;;  %s17_s14 = int_to_ptr.hbm [resolvable:$true] %s16_s14 }
   0x3   :  { %s18_s16 = sshll.u32 %s189_s15, 4  ;;  %s26_s19 = sshll.u32 %s227_s1, 4  ;;  %s19_s16 = int_to_ptr.vmem [resolvable:$true] %s18_s16  ;;  %s27_s19 = int_to_ptr.hbm [resolvable:$true] %s26_s19 }
   0x4   :  { %21 = dma.hbm_to_vmem [thread:$0]  %s17_s14, 128, %s19_s16, [#allocation3]  }
   0x5   :  { %s190_s20 = smov [#allocation5]   ;;  %s191_s22 = smov 128  }
   0x6   :  { %s28_s21 = sshll.u32 %s190_s20, 4  ;;  %s192_s23 = smov 8   ;;  %s29_s21 = int_to_ptr.vmem [resolvable:$true] %s28_s21 }
   0x7   :  { %34 = dma.hbm_to_vmem [thread:$0]  %s27_s19, 2048, %s29_s21, [#allocation6], %s191_s22, %s191_s22, %s192_s23  }
   0x8   :  { %183 = dma.done.wait [#allocation3], 128  }
   0x9   :  { %184 = vsyncadd [#allocation3], 4294967168 }
   0xa   :  { %185 = dma.done.wait [#allocation6], 2048  }
   0xb   :  { %186 = vsyncadd [#allocation6], 4294965248  ;;  %v61_v0 = vld [vmem:[#allocation5 + $0x78] sm:$0xff]  ;;  %v60_v1 = vld [vmem:[#allocation5 + $0x70] sm:$0xff]  ;;  %s193_s24 = smov [#allocation7]   ;;  %s94_s28 = sshll.u32 %s229_s3, 4  ;;  %s95_s28 = int_to_ptr.hbm [resolvable:$true] %s94_s28 }
   0xc   :  { %66 = vmatpush.msra.mxu0 %v61_v0  ;;  %v59_v2 = vld [vmem:[#allocation5 + $0x68] sm:$0xff]  ;;  %v58_v3 = vld [vmem:[#allocation5 + $0x60] sm:$0xff]  ;;  %v57_v4 = vld [vmem:[#allocation5 + $0x58] sm:$0xff]  ;;  %s92_s25 = sshll.u32 %s193_s24, 4  ;;  %s93_s25 = int_to_ptr.vmem [resolvable:$true] %s92_s25 }
   0xd   :  { %v56_v5 = vld [vmem:[#allocation5 + $0x50] sm:$0xff]  ;;  %v55_v6 = vld [vmem:[#allocation5 + $0x48] sm:$0xff]  ;;  %v54_v7 = vld [vmem:[#allocation5 + $0x40] sm:$0xff] }
   0xe   :  { %67 = vmatpush.msra.mxu0 %v60_v1  ;;  %v53_v8 = vld [vmem:[#allocation5 + $0x38] sm:$0xff]  ;;  %v52_v9 = vld [vmem:[#allocation5 + $0x30] sm:$0xff]  ;;  %v51_v10 = vld [vmem:[#allocation5 + $0x28] sm:$0xff] }
   0xf   :  { %v50_v11 = vld [vmem:[#allocation5 + $0x20] sm:$0xff]  ;;  %v49_v12 = vld [vmem:[#allocation5 + $0x18] sm:$0xff]  ;;  %v48_v13 = vld [vmem:[#allocation5 + $0x10] sm:$0xff] }
  0x10   :  { %68 = vmatpush.msra.mxu0 %v59_v2  ;;  %v47_v14 = vld [vmem:[#allocation5 + $0x8] sm:$0xff]  ;;  %v46_v15 = vld [vmem:[#allocation5] sm:$0xff]  ;;  %v45_v16 = vld [vmem:[#allocation2] sm:$0xff] }
  0x11   :  { %v110_v17 = vld [vmem:[%s228_s2] ss:$0 sm:$0xff] }
  0x12   :  { %69 = vmatpush.msra.mxu0 %v58_v3 }
  0x14   :  { %70 = vmatpush.msra.mxu0 %v57_v4 }
  0x16   :  { %71 = vmatpush.msra.mxu0 %v56_v5 }
  0x18   :  { %72 = vmatpush.msra.mxu0 %v55_v6 }
  0x1a   :  { %73 = vmatpush.msra.mxu0 %v54_v7 }
  0x1c   :  { %74 = vmatpush.msra.mxu0 %v53_v8 }
  0x1e   :  { %75 = vmatpush.msra.mxu0 %v52_v9 }
  0x20   :  { %76 = vmatpush.msra.mxu0 %v51_v10 }
  0x22   :  { %77 = vmatpush.msra.mxu0 %v50_v11 }
  0x24   :  { %78 = vmatpush.msra.mxu0 %v49_v12 }
  0x26   :  { %79 = vmatpush.msra.mxu0 %v48_v13 }
  0x28   :  { %80 = vmatpush.msra.mxu0 %v47_v14 }
  0x2a   :  { %81 = vmatpush.msra.mxu0 %v46_v15 }
  0x2b   :  { %82 = vmatmul.f32.vlgmr.msra.gmra.mxu0 %v45_v16 }
  0xa8   :  { %v83_v18 = vpop.f32.mrf.mxu0 }
  0xa9   :  { %v84_v19 = vadd.f32 %v110_v17, %v83_v18 }
  0xab   :  { %86 = vst [vmem:[#allocation7] sm:$0xff] %v84_v19 }
  0xac   :  { %97 = dma.vmem_to_hbm [thread:$0]  %s93_s25, 128, %s95_s28, [#allocation4]  }
  0xad   :  { %187 = dma.done.wait [#allocation4], 128  }
  0xae   :  { %188 = vsyncadd [#allocation4], 4294967168 }
  0xaf   :  { %102 = vsyncpa [#allocation3], 1 }
  0xb0   :  { %103 = vsyncpa [#allocation6], 1 }
  0xb1   :  { %104 = vsyncpa [#allocation4], 1 }

</bundles_post_ra>
